<compile_context>
chip_gen: v5e
topology: v5e:2x2
jax: 0.10.0
libtpu: 0.0.40
codegen_flags: <defaults>
</compile_context>

<pallas_src>
import functools
import math

import jax
import jax.numpy as jnp
from jax.experimental import pallas as pl
from jax.experimental.pallas import tpu as pltpu


def _prediction_kernel(x_ref, w1_ref, p1_ref, w2_ref, b2_ref, w3_ref, b3_ref,
                       o_ref, *, eps):
    # x_ref: (TM, Din); w*_ref pre-transposed to (in, out);
    # p1_ref: (3, h1) f32 rows = [b1, gamma, beta]; b2/b3: (1, n) f32.
    x = x_ref[...]

    # ---- Linear 1 (MXU, native dtype operands, f32 accumulate) ----
    h = jnp.dot(x, w1_ref[...], preferred_element_type=jnp.float32)
    p1 = p1_ref[...]                       # (3, h1) float32
    h = h + p1[0:1, :]                     # + b1

    # ---- LayerNorm over last dim (f32, biased variance, torch eps) ----
    mu = jnp.mean(h, axis=-1, keepdims=True)
    c = h - mu
    var = jnp.mean(c * c, axis=-1, keepdims=True)
    hn = c * jax.lax.rsqrt(var + eps)      # EUP rsqrt
    hn = hn * p1[1:2, :] + p1[2:3, :]      # * gamma + beta

    # ---- Dropout(p=0.25): identity at inference ----
    # TODO(synk): training-mode stochastic dropout (pltpu.prng_*) not implemented.

    # ---- ReLU ----
    h1 = jnp.maximum(hn, 0.0)

    # ---- Linear 2 + ReLU ----
    h2 = jnp.dot(h1.astype(w2_ref.dtype), w2_ref[...],
                 preferred_element_type=jnp.float32)
    h2 = jnp.maximum(h2 + b2_ref[...], 0.0)

    # ---- Linear 3 (output columns zero-padded to a lane-dense width) ----
    out = jnp.dot(h2.astype(w3_ref.dtype), w3_ref[...],
                  preferred_element_type=jnp.float32)
    out = out + b3_ref[...]

    o_ref[...] = out.astype(o_ref.dtype)


def _choose_row_tile(m):
    """Large row tiles for bandwidth (HBM-roofline fraction keeps rising up to
    ~512-row tiles), but keep grid >= 4 when M permits so v7x's two
    TensorCores (dimension_semantics="parallel") each get >= 2 pipelined
    steps.  Small problems fall back to 8-row tiles."""
    tm = 512
    while tm > 8 and m < 4 * tm:
        tm //= 2
    # never exceed the (8-aligned) problem size
    return max(8, min(tm, ((m + 7) // 8) * 8))


def prediction_pallas(x, w1, b1, gamma, beta, w2, b2, w3, b3, *, eps=1e-5):
    """Pallas equivalent of TransRAC `Prediction.forward` (eval mode).

    x:           (..., input_dim)   float32 or bfloat16
    w1,w2,w3:    (in, out) — already transposed relative to torch's (out, in)
    b1,b2,b3, gamma, beta: 1-D parameter vectors
    returns:     (..., out_dim)     same dtype as x
    """
    lead_shape = x.shape[:-1]
    din = x.shape[-1]
    h1 = w1.shape[1]
    h2 = w2.shape[1]
    dout = w3.shape[1]

    m = int(math.prod(lead_shape)) if lead_shape else 1
    # No row padding: the ragged last tile is handled by Pallas (partial read,
    # masked write).  Undefined rows only flow through row-independent math
    # and are never written back — keep that invariant if cross-row mixing is
    # ever added to the kernel body.
    xf = x.reshape(m, din)

    tm = _choose_row_tile(m)
    grid_m = pl.cdiv(m, tm)

    # Lane-dense output: pad W3/b3 columns to a multiple of 128 (tiny, one-time
    # op on the weights) so output stores are unmasked dense vst.
    dout_pad = ((dout + 127) // 128) * 128
    if dout_pad != dout:
        w3p = jnp.pad(w3, ((0, 0), (0, dout_pad - dout)))
        b3p = jnp.pad(b3, (0, dout_pad - dout))
    else:
        w3p, b3p = w3, b3

    # LayerNorm / bias params kept in f32 regardless of the matmul dtype.
    p1 = jnp.stack([b1, gamma, beta]).astype(jnp.float32)      # (3, h1)
    b2r = b2.reshape(1, h2).astype(jnp.float32)
    b3r = b3p.reshape(1, dout_pad).astype(jnp.float32)

    kernel = functools.partial(_prediction_kernel, eps=eps)

    out = pl.pallas_call(
        kernel,
        out_shape=jax.ShapeDtypeStruct((m, dout_pad), x.dtype),
        grid_spec=pltpu.PrefetchScalarGridSpec(
            num_scalar_prefetch=0,
            grid=(grid_m,),
            in_specs=[
                pl.BlockSpec((tm, din), lambda i: (i, 0)),        # x row-tile
                pl.BlockSpec((din, h1), lambda i: (0, 0)),        # W1 (resident)
                pl.BlockSpec((3, h1), lambda i: (0, 0)),          # [b1, gamma, beta]
                pl.BlockSpec((h1, h2), lambda i: (0, 0)),         # W2
                pl.BlockSpec((1, h2), lambda i: (0, 0)),          # b2
                pl.BlockSpec((h2, dout_pad), lambda i: (0, 0)),   # W3 (lane-padded)
                pl.BlockSpec((1, dout_pad), lambda i: (0, 0)),    # b3
            ],
            out_specs=pl.BlockSpec((tm, dout_pad), lambda i: (i, 0)),
        ),
        compiler_params=pltpu.CompilerParams(
            dimension_semantics=("parallel",),
            # default scoped VMEM limit is ample for this footprint on all gens
        ),
    )(xf, w1, p1, w2, b2r, w3p, b3r)

    if dout_pad != dout:
        out = out[:, :dout]
    return out.reshape(*lead_shape, dout)


def _reference(x, w1, b1, gamma, beta, w2, b2, w3, b3, eps=1e-5):
    h = x @ w1 + b1
    mu = jnp.mean(h, axis=-1, keepdims=True)
    var = jnp.mean((h - mu) ** 2, axis=-1, keepdims=True)
    h = (h - mu) / jnp.sqrt(var + eps) * gamma + beta
    h = jnp.maximum(h, 0.0)
    h = jnp.maximum(h @ w2 + b2, 0.0)
    return h @ w3 + b3


if __name__ == "__main__":
    # Small shapes consistent with Prediction's use in TransRAC
    # (density-map head applied per frame): x = (batch, seq, input_dim)
    B, S = 2, 8
    DIN, H1, H2, DOUT = 32, 32, 16, 1

    key = jax.random.PRNGKey(0)
    ks = jax.random.split(key, 9)
    x = jax.random.normal(ks[0], (B, S, DIN), dtype=jnp.float32)
    w1 = jax.random.normal(ks[1], (DIN, H1), dtype=jnp.float32) * 0.1
    b1 = jax.random.normal(ks[2], (H1,), dtype=jnp.float32) * 0.1
    gamma = 1.0 + 0.1 * jax.random.normal(ks[3], (H1,), dtype=jnp.float32)
    beta = 0.1 * jax.random.normal(ks[4], (H1,), dtype=jnp.float32)
    w2 = jax.random.normal(ks[5], (H1, H2), dtype=jnp.float32) * 0.1
    b2 = jax.random.normal(ks[6], (H2,), dtype=jnp.float32) * 0.1
    w3 = jax.random.normal(ks[7], (H2, DOUT), dtype=jnp.float32) * 0.1
    b3 = jax.random.normal(ks[8], (DOUT,), dtype=jnp.float32) * 0.1

    # float32 path
    out = prediction_pallas(x, w1, b1, gamma, beta, w2, b2, w3, b3)
    out = jax.block_until_ready(out)

    ref = _reference(x, w1, b1, gamma, beta, w2, b2, w3, b3)
    assert out.shape == (B, S, DOUT), out.shape
    assert jnp.allclose(out, ref, atol=1e-4, rtol=1e-4), "mismatch vs reference"

    # bfloat16 activations/weights (MXU-native rate); LN/bias math stays f32
    out_bf16 = prediction_pallas(
        x.astype(jnp.bfloat16),
        w1.astype(jnp.bfloat16), b1, gamma, beta,
        w2.astype(jnp.bfloat16), b2,
        w3.astype(jnp.bfloat16), b3)
    out_bf16 = jax.block_until_ready(out_bf16)
    assert out_bf16.shape == (B, S, DOUT), out_bf16.shape
    assert bool(jnp.all(jnp.isfinite(out_bf16.astype(jnp.float32)))), "bf16 non-finite"
    assert jnp.allclose(out_bf16.astype(jnp.float32), ref, atol=0.1, rtol=0.1), \
        "bf16 mismatch vs reference"

    print("KERNEL_OK")
</pallas_src>

<mosaic_0001>
module attributes {stable_mosaic.version = 11 : i64} {
  func.func @_prediction_kernel(%arg0: i32, %arg1: memref<8x32xf32, #tpu.memory_space<vmem>>, %arg2: memref<32x32xf32, #tpu.memory_space<vmem>>, %arg3: memref<3x32xf32, #tpu.memory_space<vmem>>, %arg4: memref<32x16xf32, #tpu.memory_space<vmem>>, %arg5: memref<1x16xf32, #tpu.memory_space<vmem>>, %arg6: memref<16x128xf32, #tpu.memory_space<vmem>>, %arg7: memref<1x128xf32, #tpu.memory_space<vmem>>, %arg8: memref<8x128xf32, #tpu.memory_space<vmem>>) attributes {dimension_semantics = [#tpu.dimension_semantics<parallel>], iteration_bounds = array<i64: 2>, scalar_prefetch = 0 : i64, scratch_operands = 0 : i64, tpu.core_type = #tpu.core_type<tc>, window_params = [{transform_indices = @transform_0, window_bounds = array<i64: 8, 32>}, {pipeline_mode = #tpu.pipeline_mode<synchronous>, transform_indices = @transform_1, window_bounds = array<i64: 32, 32>}, {pipeline_mode = #tpu.pipeline_mode<synchronous>, transform_indices = @transform_2, window_bounds = array<i64: 3, 32>}, {pipeline_mode = #tpu.pipeline_mode<synchronous>, transform_indices = @transform_3, window_bounds = array<i64: 32, 16>}, {pipeline_mode = #tpu.pipeline_mode<synchronous>, transform_indices = @transform_4, window_bounds = array<i64: 1, 16>}, {pipeline_mode = #tpu.pipeline_mode<synchronous>, transform_indices = @transform_5, window_bounds = array<i64: 16, 128>}, {pipeline_mode = #tpu.pipeline_mode<synchronous>, transform_indices = @transform_6, window_bounds = array<i64: 1, 128>}, {transform_indices = @transform_7, window_bounds = array<i64: 8, 128>}]} {
    %c0 = arith.constant 0 : index
    %c0_0 = arith.constant 0 : index
    %0 = vector.load %arg1[%c0, %c0_0] : memref<8x32xf32, #tpu.memory_space<vmem>>, vector<8x32xf32>
    %c0_1 = arith.constant 0 : index
    %c0_2 = arith.constant 0 : index
    %1 = vector.load %arg2[%c0_1, %c0_2] : memref<32x32xf32, #tpu.memory_space<vmem>>, vector<32x32xf32>
    %cst = arith.constant dense<0.000000e+00> : vector<8x32xf32>
    %2 = tpu.matmul %0, %1, %cst {dimension_numbers = #tpu.dot_dimension_numbers<[1], [0], [0], [1], [0, 0, 1, 1], [], []>} : vector<8x32xf32>, vector<32x32xf32>, vector<8x32xf32> -> vector<8x32xf32>
    %c0_3 = arith.constant 0 : index
    %c0_4 = arith.constant 0 : index
    %3 = vector.load %arg3[%c0_3, %c0_4] : memref<3x32xf32, #tpu.memory_space<vmem>>, vector<3x32xf32>
    %4 = vector.extract_strided_slice %3 {offsets = [0, 0], sizes = [1, 32], strides = [1, 1]} : vector<3x32xf32> to vector<1x32xf32>
    %5 = vector.broadcast %4 : vector<1x32xf32> to vector<8x32xf32>
    %6 = arith.addf %2, %5 : vector<8x32xf32>
    %cst_5 = arith.constant dense<0.000000e+00> : vector<8xf32>
    %7 = vector.multi_reduction <add>, %6, %cst_5 [1] : vector<8x32xf32> to vector<8xf32>
    %8 = vector.shape_cast %7 : vector<8xf32> to vector<8x1xf32>
    %cst_6 = arith.constant 3.200000e+01 : f32
    %9 = vector.broadcast %cst_6 : f32 to vector<8x1xf32>
    %10 = arith.divf %8, %9 : vector<8x1xf32>
    %11 = vector.broadcast %10 : vector<8x1xf32> to vector<8x32xf32>
    %12 = arith.subf %6, %11 : vector<8x32xf32>
    %13 = arith.mulf %12, %12 : vector<8x32xf32>
    %cst_7 = arith.constant dense<0.000000e+00> : vector<8xf32>
    %14 = vector.multi_reduction <add>, %13, %cst_7 [1] : vector<8x32xf32> to vector<8xf32>
    %15 = vector.shape_cast %14 : vector<8xf32> to vector<8x1xf32>
    %cst_8 = arith.constant 3.200000e+01 : f32
    %16 = vector.broadcast %cst_8 : f32 to vector<8x1xf32>
    %17 = arith.divf %15, %16 : vector<8x1xf32>
    %cst_9 = arith.constant 9.99999974E-6 : f32
    %18 = vector.broadcast %cst_9 : f32 to vector<8x1xf32>
    %19 = arith.addf %17, %18 : vector<8x1xf32>
    %20 = math.rsqrt %19 : vector<8x1xf32>
    %21 = vector.broadcast %20 : vector<8x1xf32> to vector<8x32xf32>
    %22 = arith.mulf %12, %21 : vector<8x32xf32>
    %23 = vector.extract_strided_slice %3 {offsets = [1, 0], sizes = [1, 32], strides = [1, 1]} : vector<3x32xf32> to vector<1x32xf32>
    %24 = vector.broadcast %23 : vector<1x32xf32> to vector<8x32xf32>
    %25 = arith.mulf %22, %24 : vector<8x32xf32>
    %26 = vector.extract_strided_slice %3 {offsets = [2, 0], sizes = [1, 32], strides = [1, 1]} : vector<3x32xf32> to vector<1x32xf32>
    %27 = vector.broadcast %26 : vector<1x32xf32> to vector<8x32xf32>
    %28 = arith.addf %25, %27 : vector<8x32xf32>
    %cst_10 = arith.constant 0.000000e+00 : f32
    %29 = vector.broadcast %cst_10 : f32 to vector<8x32xf32>
    %30 = arith.maximumf %28, %29 : vector<8x32xf32>
    %c0_11 = arith.constant 0 : index
    %c0_12 = arith.constant 0 : index
    %31 = vector.load %arg4[%c0_11, %c0_12] : memref<32x16xf32, #tpu.memory_space<vmem>>, vector<32x16xf32>
    %cst_13 = arith.constant dense<0.000000e+00> : vector<8x16xf32>
    %32 = tpu.matmul %30, %31, %cst_13 {dimension_numbers = #tpu.dot_dimension_numbers<[1], [0], [0], [1], [0, 0, 1, 1], [], []>} : vector<8x32xf32>, vector<32x16xf32>, vector<8x16xf32> -> vector<8x16xf32>
    %c0_14 = arith.constant 0 : index
    %c0_15 = arith.constant 0 : index
    %33 = vector.load %arg5[%c0_14, %c0_15] : memref<1x16xf32, #tpu.memory_space<vmem>>, vector<1x16xf32>
    %34 = vector.broadcast %33 : vector<1x16xf32> to vector<8x16xf32>
    %35 = arith.addf %32, %34 : vector<8x16xf32>
    %cst_16 = arith.constant 0.000000e+00 : f32
    %36 = vector.broadcast %cst_16 : f32 to vector<8x16xf32>
    %37 = arith.maximumf %35, %36 : vector<8x16xf32>
    %c0_17 = arith.constant 0 : index
    %c0_18 = arith.constant 0 : index
    %38 = vector.load %arg6[%c0_17, %c0_18] : memref<16x128xf32, #tpu.memory_space<vmem>>, vector<16x128xf32>
    %cst_19 = arith.constant dense<0.000000e+00> : vector<8x128xf32>
    %39 = tpu.matmul %37, %38, %cst_19 {dimension_numbers = #tpu.dot_dimension_numbers<[1], [0], [0], [1], [0, 0, 1, 1], [], []>} : vector<8x16xf32>, vector<16x128xf32>, vector<8x128xf32> -> vector<8x128xf32>
    %c0_20 = arith.constant 0 : index
    %c0_21 = arith.constant 0 : index
    %40 = vector.load %arg7[%c0_20, %c0_21] : memref<1x128xf32, #tpu.memory_space<vmem>>, vector<1x128xf32>
    %41 = vector.broadcast %40 : vector<1x128xf32> to vector<8x128xf32>
    %42 = arith.addf %39, %41 : vector<8x128xf32>
    %c0_22 = arith.constant 0 : index
    %c0_23 = arith.constant 0 : index
    %43 = vector.load %arg8[%c0_22, %c0_23] : memref<8x128xf32, #tpu.memory_space<vmem>>, vector<8x128xf32>
    tpu.vector_store %arg8[%c0_22, %c0_23], %42 {strides = array<i32>} : memref<8x128xf32, #tpu.memory_space<vmem>>, vector<8x128xf32>,
    return
  }
  func.func @transform_0(%arg0: i32) -> (i32, i32) {
    %c0_i32 = arith.constant 0 : i32
    %c0_i32_0 = arith.constant 0 : i32
    return %arg0, %c0_i32 : i32, i32
  }
  func.func @transform_1(%arg0: i32) -> (i32, i32) {
    %c0_i32 = arith.constant 0 : i32
    %c0_i32_0 = arith.constant 0 : i32
    %c0_i32_1 = arith.constant 0 : i32
    return %c0_i32, %c0_i32_0 : i32, i32
  }
  func.func @transform_2(%arg0: i32) -> (i32, i32) {
    %c0_i32 = arith.constant 0 : i32
    %c0_i32_0 = arith.constant 0 : i32
    %c0_i32_1 = arith.constant 0 : i32
    return %c0_i32, %c0_i32_0 : i32, i32
  }
  func.func @transform_3(%arg0: i32) -> (i32, i32) {
    %c0_i32 = arith.constant 0 : i32
    %c0_i32_0 = arith.constant 0 : i32
    %c0_i32_1 = arith.constant 0 : i32
    return %c0_i32, %c0_i32_0 : i32, i32
  }
  func.func @transform_4(%arg0: i32) -> (i32, i32) {
    %c0_i32 = arith.constant 0 : i32
    %c0_i32_0 = arith.constant 0 : i32
    %c0_i32_1 = arith.constant 0 : i32
    return %c0_i32, %c0_i32_0 : i32, i32
  }
  func.func @transform_5(%arg0: i32) -> (i32, i32) {
    %c0_i32 = arith.constant 0 : i32
    %c0_i32_0 = arith.constant 0 : i32
    %c0_i32_1 = arith.constant 0 : i32
    return %c0_i32, %c0_i32_0 : i32, i32
  }
  func.func @transform_6(%arg0: i32) -> (i32, i32) {
    %c0_i32 = arith.constant 0 : i32
    %c0_i32_0 = arith.constant 0 : i32
    %c0_i32_1 = arith.constant 0 : i32
    return %c0_i32, %c0_i32_0 : i32, i32
  }
  func.func @transform_7(%arg0: i32) -> (i32, i32) {
    %c0_i32 = arith.constant 0 : i32
    %c0_i32_0 = arith.constant 0 : i32
    return %arg0, %c0_i32 : i32, i32
  }
}

</mosaic_0001>

<bundles_post_ra>
// kernel: tpu_custom_call.1
= control target key start
LH: loop header
LB: loop body
LE: loop exit
PB: predicated region body
PF: predicated region fallthrough
CT: control target
= control target key end

     0   :  { %12 = vsyncpa [#allocation3], 0  ;;  %s938_s0 = inlined_call_operand.vmem [shape: f32[16,32], index: 0, kind: input, shape index: {}]   ;;  %s939_s1 = inlined_call_operand.vmem [shape: f32[32,32], index: 1, kind: input, shape index: {}]   ;;  %s940_s2 = inlined_call_operand.hbm [shape: f32[3,32], index: 2, kind: input, shape index: {}]   ;;  %s941_s3 = inlined_call_operand.vmem [shape: f32[32,16], index: 3, kind: input, shape index: {}]   ;;  %s942_s4 = inlined_call_operand.vmem [shape: f32[1,16], index: 4, kind: input, shape index: {}]   ;;  %s943_s5 = inlined_call_operand.hbm [shape: f32[16,128], index: 5, kind: input, shape index: {}]   ;;  %s944_s6 = inlined_call_operand.vmem [shape: f32[1,128], index: 6, kind: input, shape index: {}]   ;;  %s945_s7 = inlined_call_operand.hbm [shape: f32[16,128], index: 7, kind: output, shape index: {}]  }
   0x1   :  { %13 = vsyncpa [#allocation6], 0 }
   0x2   :  { %14 = vsyncpa [#allocation4], 0 }
   0x3   :  { %16 = vsyncpa [#allocation4 + $0x1], 0  ;;  %s794_s24 = smov 0   ;;  %s796_s25 = smov 0  }
   0x4   :  { %s798_s26 = smov 0   ;;  %s800_s27 = smov 0  }
   0x5 LB: > { %s815_s28 = sadd.s32 4294967295, %s747_s27   ;;  %s531_s29 = sadd.s32 4294967294, %s747_s27   ;;  %s747_s27 = sphi %s800_s27, %s952_s27   ;;  %s743_s26 = sphi %s798_s26, %s951_s26   ;;  %s739_s25 = sphi %s796_s25, %s950_s25   ;;  %s735_s24 = sphi %s794_s24, %s949_s24  }
   0x6   : > { %s819_s30 = sadd.s32 1, %s747_s27   ;;  %s181_s8 = sadd.s32 1, %s743_s26 }
   0x7   : > { %s178_s9 = ssub.s32 %s747_s27, %s819_s30  ;;  %p191_p0 = scmp.ne.s32.totalorder %s743_s26, %s739_s25 }
   0x8   : > { %p179_p1 = scmp.eq.s32.totalorder %s178_s9, 0  ;;  %p192_p2 = scmp.eq.s32.totalorder %s815_s28, 1 }
   0x9   : > { %p197_p3 = scmp.ne.s32.totalorder %s739_s25, %s735_s24  ;;  %p198_p4 = scmp.eq.s32.totalorder %s531_s29, 1 }
   0xa   : > { %s830_s10 = scalar_select %p179_p1, %s743_s26, %s181_s8  }
   0xb   : > { %p832_p5 = por %p192_p2, %p191_p0  ;;  %p836_p6 = por %p198_p4, %p197_p3 }
   0xc   : > { %p532_p7 = scmp.ge.s32.totalorder %s747_s27, 1  ;;  %p205_p8 = scmp.lt.s32.totalorder %s747_s27, 3 }
   0xd   : > { %p569_p9 = scmp.eq.s32.totalorder %s815_s28, 0  ;;  %s220_s16 = sshll.u32 %s940_s2, 4  ;;  %s221_s16 = int_to_ptr.hbm [resolvable:$true] %s220_s16 }
   0xe   : > { %p843_p10 = pnand %p532_p7, %p205_p8  ;;  %s749_s17 = smov [#allocation2]  }
   0xf   : > { %s222_s18 = sshll.u32 %s749_s17, 4  ;;  %s237_s21 = sshll.u32 %s943_s5, 4  ;;  %s223_s18 = int_to_ptr.vmem [resolvable:$true] %s222_s18  ;;  %s238_s21 = int_to_ptr.hbm [resolvable:$true] %s237_s21 }
  0x10   : > { %p558_p11 = pneg %p843_p10  ;;  %s750_s22 = smov [#allocation5]  }
  0x11   : > { %s239_s23 = sshll.u32 %s750_s22, 4  ;;  %s751_s29 = smov 128   ;;  %s240_s23 = int_to_ptr.vmem [resolvable:$true] %s239_s23 }
  0x12   : > { %p559_p12 = pnand %p569_p9, %p558_p11  ;;  %s752_s8 = smov 8  }
  0x13   : > { %265 = sbr.rel (%p843_p10) target bundleno = 700 (0x2bc), region = 48 }
  0x14   : > { %561 = dma.hbm_to_vmem [thread:$0]  (!%p559_p12), %s221_s16, 64, %s223_s18, [#allocation3]  }
  0x15   : > { %564 = dma.hbm_to_vmem [thread:$0]  (!%p559_p12), %s238_s21, 256, %s240_s23, [#allocation6], %s751_s29, %s751_s29, %s752_s8  }
  0x18   : > { %722 = dma.done.wait (%p569_p9), [#allocation3], 64  }
  0x19   : > { %724 = vsyncadd (%p569_p9), [#allocation3], 4294967232 }
  0x1a   : > { %726 = dma.done.wait (%p569_p9), [#allocation6], 256  }
  0x1b   : > { %728 = vsyncadd (%p569_p9), [#allocation6], 4294967040  ;;  %p302_p13 = scmp.lt.s32.totalorder %s815_s28, 1  ;;  %v310_v0 = vld [vmem:[%s939_s1 + $0x18] sm:$0xff]  ;;  %v309_v1 = vld [vmem:[%s939_s1 + $0x10] sm:$0xff]  ;;  %vm313_vm0 = vcmask 261120  }
  0x1c   : > { %329 = vmatpush.msra.mxu0 %v310_v0  ;;  %v308_v2 = vld [vmem:[%s939_s1 + $0x8] sm:$0xff]  ;;  %v307_v3 = vld [vmem:[%s939_s1] sm:$0xff]  ;;  %v753_v10 = vmov 32.0   ;;  %v374_v22 = vld [vmem:[%s941_s3 + $0x18] sm:$0xff]  ;;  %vm409_vm5 = vcmask 130048   ;;  %s299_s21 = sand.u32 1, %s739_s25  }
  0x1d   : > { %s303_s9 = scalar_select %p302_p13, %s815_s28, 1  ;;  %v311_v5 = vld [vmem:[#allocation2] sm:$0x7]  ;;  %613 = vrcp.f32 %v753_v10  ;;  %v373_v23 = vld [vmem:[%s941_s3 + $0x10] sm:$0xff]  ;;  %394 = vmatpush.msra.mxu1 %v374_v22  ;;  %v372_v24 = vld [vmem:[%s941_s3 + $0x8] sm:$0xff] }
  0x1e   : > { %330 = vmatpush.msra.mxu0 %v309_v1  ;;  %v312_v6 = vperm.slane %v311_v5, 0  ;;  %v371_v25 = vld [vmem:[%s941_s3] sm:$0xff]  ;;  %v366_v35 = vperm.slane %v311_v5, 1  ;;  %v368_v38 = vperm.slane %v311_v5, 2  ;;  %v404_v42 = vld [vmem:[#allocation5 + $0x8] sm:$0xff]  ;;  %s545_s23 = sshll.u32 %s815_s28, 3 }
  0x1f   : > { %s540_s14 = sshll.u32 %s303_s9, 3  ;;  %395 = vmatpush.msra.mxu1 %v373_v23  ;;  %427 = vmatpush.msra.mxu2 %v404_v42  ;;  %v403_v43 = vld [vmem:[#allocation5] sm:$0xff]  ;;  %v611_v44 = vld [vmem:[%s942_s4] ss:$0 sm:$0xff]  ;;  %s445_s9 = scalar_lea.hbm %s945_s7, %s545_s23 }
  0x20   : > { %s305_s22 = scalar_lea.vmem %s938_s0, %s540_s14  ;;  %331 = vmatpush.msra.mxu0 %v308_v2  ;;  %v612_v48 = vld [vmem:[%s944_s6] ss:$0 sm:$0xff]  ;;  %s449_s17 = sshll.u32 %s445_s9, 4  ;;  %s450_s17 = int_to_ptr.hbm [resolvable:$true] %s449_s17 }
  0x21   : > { %v306_v4 = vld [vmem:[%s305_s22] sm:$0xff]  ;;  %396 = vmatpush.msra.mxu1 %v372_v24  ;;  %428 = vmatpush.msra.mxu2 %v403_v43  ;;  %s539_s22 = sshll.u32 %s299_s21, 3  ;;  %s435_s18 = scalar_lea.sflag [#allocation4], %s299_s21 }
  0x22   : > { %332 = vmatpush.msra.mxu0 %v307_v3  ;;  %s301_s13 = scalar_lea.vmem [#allocation7], %s539_s22  ;;  %s691_s19 = sshra.s32 %s450_s17, 4  ;;  %s692_s19 = int_to_ptr.hbm [resolvable:$true] %s691_s19 }
  0x23   : > { %541 = vmatmul.msk.f32.vlgmr.msra.gmra.mxu0 %vm313_vm0, %v306_v4  ;;  %v614_v11 = vpop.eup %613  ;;  %397 = vmatpush.msra.mxu1 %v371_v25  ;;  %s447_s16 = sshll.u32 %s301_s13, 4  ;;  %s693_s28 = scalar_lea.hbm %s692_s19, 8  ;;  %s448_s16 = int_to_ptr.vmem [resolvable:$true] %s447_s16 }
  0x24   : > { %v341_v12 = vmul.f32 32.0, %v614_v11  ;;  %vm345_vm1 = vweird.f32 %v614_v11  ;;  %p694_p0 = scmp.ne.s32.totalorder %s692_s19, %s693_s28  ;;  %s697_s29 = scalar_lea.hbm %s945_s7, 16 }
  0x25   : > { %p698_p3 = scmp.lt.s32.totalorder %s692_s19, %s945_s7  ;;  %p699_p4 = scmp.lt.s32.totalorder %s697_s29, %s693_s28 }
  0x26   : > { %v342_v13 = vsub.f32 1.0, %v341_v12  ;;  %p695_p1 = pnand %p694_p0, %p832_p5 }
  0x27   : > { %p700_p7 = por %p699_p4, %p698_p3 }
  0x28   : > { %v343_v14 = vmul.f32 %v614_v11, %v342_v13  ;;  %p696_p2 = pneg %p695_p1 }
  0x2a   : > { %v344_v15 = vadd.f32 %v614_v11, %v343_v14  ;;  %p701_p8 = pnand %p700_p7, %p696_p2 }
  0x2c   : > { %v346_v16 = vsel %vm345_vm1, %v614_v11, %v344_v15 }
  0xa0   : > { %v334_v7 = vpop.f32.mrf.mxu0 }
  0xa1   : > { %v335_v8 = vadd.f32 %v334_v7, %v312_v6 }
  0xa3   : > { %v337_v9 = vsel %vm313_vm0, %v335_v8, 0.0 }
  0xa4   : > { %338 = vadd.xlane.f32.xlu0 %v337_v9 }
 0x117   : > { %v339_v17 = vpop.xlane.xlu0 %338 }
 0x118   : > { %v347_v18 = vmul.f32 %v346_v16, %v339_v17 }
 0x11a   : > { %v348_v19 = vsub.f32 %v335_v8, %v347_v18 }
 0x11c   : > { %v349_v20 = vmul.f32 %v348_v19, %v348_v19 }
 0x11e   : > { %v350_v21 = vsel %vm313_vm0, %v349_v20, 0.0 }
 0x11f   : > { %351 = vadd.xlane.f32.xlu0 %v350_v21 }
 0x192   : > { %v352_v26 = vpop.xlane.xlu0 %351 }
 0x193   : > { %v353_v27 = vmul.f32 %v352_v26, %v346_v16 }
 0x195   : > { %v354_v28 = vadd.f32 1e-05, %v353_v27 }
 0x197   : > { %615 = vrsqrt.f32 %v354_v28  ;;  %vm361_vm3 = vweird.f32 %v354_v28 }
 0x19d   : > { %v616_v29 = vpop.eup %615 }
 0x19e   : > { %v356_v30 = vmul.f32 %v616_v29, %v354_v28  ;;  %vm362_vm2 = vweird.f32 %v616_v29 }
 0x19f   : > { %vm363_vm4 = vmor %vm361_vm3, %vm362_vm2 }
 0x1a0   : > { %v357_v31 = vmul.f32 %v616_v29, %v356_v30 }
 0x1a2   : > { %v358_v32 = vmul.f32 0.5, %v357_v31 }
 0x1a4   : > { %v359_v33 = vsub.f32 1.5, %v358_v32 }
 0x1a6   : > { %v360_v34 = vmul.f32 %v616_v29, %v359_v33 }
 0x1a8   : > { %v364_v36 = vsel %vm363_vm4, %v616_v29, %v360_v34 }
 0x1a9   : > { %v365_v37 = vmul.f32 %v364_v36, %v348_v19 }
 0x1ab   : > { %v367_v39 = vmul.f32 %v366_v35, %v365_v37 }
 0x1ad   : > { %v369_v40 = vadd.f32 %v368_v38, %v367_v39 }
 0x1af   : > { %v370_v41 = vmax.f32 %v369_v40, 0.0 }
 0x1b1   : > { %542 = vmatmul.msk.f32.vlgmr.msra.gmra.mxu1 %vm313_vm0, %v370_v41 }
 0x22e   : > { %v399_v45 = vpop.f32.mrf.mxu1 }
 0x22f   : > { %v400_v46 = vadd.f32 %v611_v44, %v399_v45 }
 0x231   : > { %v402_v47 = vmax.f32 %v400_v46, 0.0 }
 0x233   : > { %543 = vmatmul.msk.f32.vlgmr.msra.gmra.mxu2 %vm409_vm5, %v402_v47 }
 0x2b6   : > { %v430_v49 = vpop.f32.mrf.mxu2 }
 0x2b7   : > { %v431_v50 = vadd.f32 %v612_v48, %v430_v49 }
 0x2b9   : > { %433 = vst [vmem:[%s301_s13] sm:$0xff] %v431_v50 }
 0x2ba   : > { %704 = shalt.err (!%p701_p8)
}
 0x2bb   : > { %556 = dma.vmem_to_hbm [thread:$0]  (%p832_p5), %s448_s16, 128, %s450_s17, %s435_s18  }
 0x2bc PF: > { %p573_p9 = scmp.ge.s32.totalorder %s747_s27, 2  ;;  %s461_s21 = sand.u32 1, %s735_s24  }
 0x2bd   : > { %s462_s9 = scalar_lea.sflag [#allocation4], %s461_s21 }
 0x2be   : > { %p566_p10 = pnand %p573_p9, %p836_p6 }
 0x2c0   : > { %p567_p11 = pneg %p566_p10 }
 0x2c2   : > { %730 = dma.done.wait (%p567_p11), %s462_s9, 128  }
 0x2c3   : > { %732 = vsyncadd (%p567_p11), %s462_s9, 4294967168  ;;  %p19_p12 = scmp.ge.s32.totalorder %s819_s30, 4   ;;  %s949_s24 = smov %s739_s25 }
 0x2c4   : > { %s950_s25 = smov %s743_s26  ;;  %s951_s26 = smov %s830_s10 }
 0x2c5   : > { %s952_s27 = smov %s819_s30  ;;  %21 = sbr.rel (!%p19_p12) target bundleno = 5 (0x5), region = 92 }
 0x2ca   :  { %468 = vsyncpa [#allocation3], 1 }
 0x2cb   :  { %470 = vsyncpa [#allocation3 + $0x1], 1 }
 0x2cc   :  { %471 = vsyncpa [#allocation6], 1 }
 0x2cd   :  { %472 = vsyncpa [#allocation4], 1 }
 0x2ce   :  { %474 = vsyncpa [#allocation4 + $0x1], 1 }

</bundles_post_ra>
